<compile_context>
chip_gen: v5e
topology: v5e:2x2
jax: 0.10.0
libtpu: 0.0.40
codegen_flags: <defaults>
</compile_context>

<pallas_src>
import functools

import jax
import jax.numpy as jnp
from jax import lax
from jax.experimental import pallas as pl
from jax.experimental.pallas import tpu as pltpu


def _round_up(x, m):
    return (x + m - 1) // m * m


# ---------------------------------------------------------------------------
# Phase 1: batch-independent operator construction.
#   M_stack[:, k*n_in:(k+1)*n_in]         = transform @ T^(k+1) @ transform.T
#   L_stack[:, k*n_latent:(k+1)*n_latent] = transform @ T^k        (latent=True)
# ---------------------------------------------------------------------------
def _make_operator_kernel(steps: int, n_in: int, n_latent: int, with_latent: bool):

    def kernel(tf_ref, tr_ref, m_ref, *lat_refs):
        transform = tf_ref[...]            # (n_in, n_latent)
        T = tr_ref[...]                    # (n_latent, n_latent)

        # Prefix powers S = [T^1 | T^2 | ... ] by doubling:
        #   [T^1..T^m]  ->  [T^1..T^m | T^m@T^1 .. T^m@T^m] = [T^1..T^2m]
        # Only ceil(log2(steps)) dependent matmuls.
        S = T                               # (n_latent, n_latent) == [T^1]
        m = 1
        while m < steps:
            Tm = S[:, (m - 1) * n_latent: m * n_latent]        # T^m
            S = jnp.concatenate(
                [S, jnp.dot(Tm, S, preferred_element_type=jnp.float32)],
                axis=1)
            m *= 2
        S = S[:, : steps * n_latent]        # (n_latent, steps*n_latent)

        # Fold transform in with one wide matmul:
        #   L_part[:, k*n_latent:(k+1)*n_latent] = transform @ T^(k+1)
        L_part = jnp.dot(transform, S, preferred_element_type=jnp.float32)

        # M_k = (transform @ T^(k+1)) @ transform^T, written blockwise into
        # the lane-stacked operator slab (no in-kernel concat, bounded
        # live ranges).  These matmuls are independent (no serial chain).
        for k in range(steps):
            blk = L_part[:, k * n_latent:(k + 1) * n_latent]    # (n_in, n_latent)
            m_ref[:, k * n_in:(k + 1) * n_in] = lax.dot_general(
                blk, transform,
                dimension_numbers=(((1,), (1,)), ((), ())),     # blk @ transform.T
                preferred_element_type=jnp.float32)

        if with_latent:
            lat_refs[0][:, :n_latent] = transform               # T^0 block
            lat_refs[0][:, n_latent:] = L_part                  # T^1..T^steps

    return kernel


# ---------------------------------------------------------------------------
# Phase 2: batched apply — one lane-dense MXU matmul per batch tile.
# ---------------------------------------------------------------------------
def _make_apply_kernel(with_latent: bool):
    if with_latent:
        def kernel(x_ref, m_ref, l_ref, o_ref, lat_ref):
            x = x_ref[...]
            o_ref[...] = jnp.dot(x, m_ref[...],
                                 preferred_element_type=jnp.float32)
            lat_ref[...] = jnp.dot(x, l_ref[...],
                                   preferred_element_type=jnp.float32)
    else:
        def kernel(x_ref, m_ref, o_ref):
            o_ref[...] = jnp.dot(x_ref[...], m_ref[...],
                                 preferred_element_type=jnp.float32)
    return kernel


@functools.partial(jax.jit, static_argnames=("steps", "latent"))
def linear_latent_forward(x, transform, transition, steps, latent=False):
    """Pallas implementation of LinearLatent.forward.

    x:          (n_batch, n_in)       float32
    transform:  (n_in, n_latent)      float32
    transition: (n_latent, n_latent)  float32
    """
    n_batch, n_in = x.shape
    n_latent = transform.shape[1]
    steps = int(steps)
    assert steps >= 1

    vmem = pl.BlockSpec(memory_space=pltpu.MemorySpace.VMEM)

    # ---- Phase 1: step-stacked operators (tiny, runs once per call) --------
    op_shapes = [jax.ShapeDtypeStruct((n_in, steps * n_in), jnp.float32)]
    if latent:
        op_shapes.append(
            jax.ShapeDtypeStruct((n_in, (steps + 1) * n_latent), jnp.float32))
    ops = pl.pallas_call(
        _make_operator_kernel(steps, n_in, n_latent, latent),
        out_shape=tuple(op_shapes),
        in_specs=[vmem, vmem],
        out_specs=tuple([vmem] * len(op_shapes)),
    )(transform, transition)
    m_stack = ops[0]

    # ---- Phase 2: batched apply, gridded over the (padded) batch axis ------
    # tile_b: multiple of 8; 512 rows fits v7x's 64 MiB VMEM with large
    # headroom — raise toward 1024-2048 on v6e/v5e (128 MiB) for big batches.
    tile_b = min(512, max(_round_up(n_batch, 8), 8))
    nb_p = _round_up(max(n_batch, 1), tile_b)
    if nb_p != n_batch:
        x_p = jnp.zeros((nb_p, n_in), x.dtype).at[:n_batch, :].set(x)
    else:
        x_p = x
    grid = (nb_p // tile_b,)

    in_specs = [
        pl.BlockSpec((tile_b, n_in), lambda i: (i, 0)),
        pl.BlockSpec((n_in, steps * n_in), lambda i: (0, 0)),   # pinned weights
    ]
    operands = [x_p, m_stack]
    out_shapes = [jax.ShapeDtypeStruct((nb_p, steps * n_in), jnp.float32)]
    out_specs = [pl.BlockSpec((tile_b, steps * n_in), lambda i: (i, 0))]
    if latent:
        in_specs.append(
            pl.BlockSpec((n_in, (steps + 1) * n_latent), lambda i: (0, 0)))
        operands.append(ops[1])
        out_shapes.append(
            jax.ShapeDtypeStruct((nb_p, (steps + 1) * n_latent), jnp.float32))
        out_specs.append(
            pl.BlockSpec((tile_b, (steps + 1) * n_latent), lambda i: (i, 0)))

    results = pl.pallas_call(
        _make_apply_kernel(latent),
        out_shape=tuple(out_shapes),
        grid_spec=pltpu.PrefetchScalarGridSpec(
            num_scalar_prefetch=0,
            grid=grid,
            in_specs=in_specs,
            out_specs=tuple(out_specs),
        ),
        compiler_params=pltpu.CompilerParams(
            dimension_semantics=("parallel",)),
    )(*operands)

    # Back to the PyTorch axis convention (time axis last).  Cheap wrapper-side
    # reshapes/transposes on small arrays.
    out = results[0][:n_batch].reshape(n_batch, steps, n_in)
    out = jnp.transpose(out, (0, 2, 1))            # (n_batch, n_in, steps)
    if latent:
        lat = results[1][:n_batch].reshape(n_batch, steps + 1, n_latent)
        lat = jnp.transpose(lat, (0, 2, 1))        # (n_batch, n_latent, steps+1)
        return out, lat
    return out


def _reference(x, transform, transition, steps):
    latent = x @ transform
    outs = []
    lats = [latent]
    for _ in range(steps):
        latent = latent @ transition
        outs.append(latent @ transform.T)
        lats.append(latent)
    return jnp.stack(outs, axis=-1), jnp.stack(lats, axis=-1)


if __name__ == "__main__":
    # Small shapes consistent with the module: n_in=16, n_latent=8, n_steps=8, batch=2.
    n_batch, n_in, n_latent, n_steps = 2, 16, 8, 8

    key = jax.random.PRNGKey(0)
    kx, kt, kr = jax.random.split(key, 3)
    x = jax.random.normal(kx, (n_batch, n_in), dtype=jnp.float32)
    transform = 0.1 * jax.random.normal(kt, (n_in, n_latent), dtype=jnp.float32)
    transition = 0.1 * jax.random.normal(kr, (n_latent, n_latent), dtype=jnp.float32)

    # latent=True path (both outputs)
    out, lat = linear_latent_forward(x, transform, transition, n_steps, latent=True)
    out = jax.block_until_ready(out)
    lat = jax.block_until_ready(lat)

    # latent=False path (latent trajectory never computed / written back)
    out_only = jax.block_until_ready(
        linear_latent_forward(x, transform, transition, n_steps, latent=False))

    # sanity-check against a pure-JAX reference
    ref_out, ref_lat = _reference(x, transform, transition, n_steps)
    assert out.shape == (n_batch, n_in, n_steps)
    assert lat.shape == (n_batch, n_latent, n_steps + 1)
    assert out_only.shape == (n_batch, n_in, n_steps)
    assert jnp.allclose(out, ref_out, atol=1e-5, rtol=1e-5)
    assert jnp.allclose(lat, ref_lat, atol=1e-5, rtol=1e-5)
    assert jnp.allclose(out_only, ref_out, atol=1e-5, rtol=1e-5)

    print("KERNEL_OK")
</pallas_src>

<mosaic_0001>
module attributes {stable_mosaic.version = 11 : i64} {
  func.func @kernel(%arg0: i32, %arg1: memref<8x16xf32, #tpu.memory_space<vmem>>, %arg2: memref<16x128xf32, #tpu.memory_space<vmem>>, %arg3: memref<16x72xf32, #tpu.memory_space<vmem>>, %arg4: memref<8x128xf32, #tpu.memory_space<vmem>>, %arg5: memref<8x72xf32, #tpu.memory_space<vmem>>) attributes {dimension_semantics = [#tpu.dimension_semantics<parallel>], iteration_bounds = array<i64: 1>, scalar_prefetch = 0 : i64, scratch_operands = 0 : i64, tpu.core_type = #tpu.core_type<tc>, window_params = [{transform_indices = @transform_0, window_bounds = array<i64: 8, 16>}, {pipeline_mode = #tpu.pipeline_mode<synchronous>, transform_indices = @transform_1, window_bounds = array<i64: 16, 128>}, {pipeline_mode = #tpu.pipeline_mode<synchronous>, transform_indices = @transform_2, window_bounds = array<i64: 16, 72>}, {transform_indices = @transform_3, window_bounds = array<i64: 8, 128>}, {transform_indices = @transform_4, window_bounds = array<i64: 8, 72>}]} {
    %c0 = arith.constant 0 : index
    %c0_0 = arith.constant 0 : index
    %0 = vector.load %arg1[%c0, %c0_0] : memref<8x16xf32, #tpu.memory_space<vmem>>, vector<8x16xf32>
    %c0_1 = arith.constant 0 : index
    %c0_2 = arith.constant 0 : index
    %1 = vector.load %arg2[%c0_1, %c0_2] : memref<16x128xf32, #tpu.memory_space<vmem>>, vector<16x128xf32>
    %cst = arith.constant dense<0.000000e+00> : vector<8x128xf32>
    %2 = tpu.matmul %0, %1, %cst {dimension_numbers = #tpu.dot_dimension_numbers<[1], [0], [0], [1], [0, 0, 1, 1], [], []>} : vector<8x16xf32>, vector<16x128xf32>, vector<8x128xf32> -> vector<8x128xf32>
    %c0_3 = arith.constant 0 : index
    %c0_4 = arith.constant 0 : index
    %3 = vector.load %arg4[%c0_3, %c0_4] : memref<8x128xf32, #tpu.memory_space<vmem>>, vector<8x128xf32>
    tpu.vector_store %arg4[%c0_3, %c0_4], %2 {strides = array<i32>} : memref<8x128xf32, #tpu.memory_space<vmem>>, vector<8x128xf32>,
    %c0_5 = arith.constant 0 : index
    %c0_6 = arith.constant 0 : index
    %4 = vector.load %arg3[%c0_5, %c0_6] : memref<16x72xf32, #tpu.memory_space<vmem>>, vector<16x72xf32>
    %cst_7 = arith.constant dense<0.000000e+00> : vector<8x72xf32>
    %5 = tpu.matmul %0, %4, %cst_7 {dimension_numbers = #tpu.dot_dimension_numbers<[1], [0], [0], [1], [0, 0, 1, 1], [], []>} : vector<8x16xf32>, vector<16x72xf32>, vector<8x72xf32> -> vector<8x72xf32>
    %c0_8 = arith.constant 0 : index
    %c0_9 = arith.constant 0 : index
    %6 = vector.load %arg5[%c0_8, %c0_9] : memref<8x72xf32, #tpu.memory_space<vmem>>, vector<8x72xf32>
    tpu.vector_store %arg5[%c0_8, %c0_9], %5 {strides = array<i32>} : memref<8x72xf32, #tpu.memory_space<vmem>>, vector<8x72xf32>,
    return
  }
  func.func @transform_0(%arg0: i32) -> (i32, i32) {
    %c0_i32 = arith.constant 0 : i32
    %c0_i32_0 = arith.constant 0 : i32
    return %arg0, %c0_i32 : i32, i32
  }
  func.func @transform_1(%arg0: i32) -> (i32, i32) {
    %c0_i32 = arith.constant 0 : i32
    %c0_i32_0 = arith.constant 0 : i32
    %c0_i32_1 = arith.constant 0 : i32
    return %c0_i32, %c0_i32_0 : i32, i32
  }
  func.func @transform_2(%arg0: i32) -> (i32, i32) {
    %c0_i32 = arith.constant 0 : i32
    %c0_i32_0 = arith.constant 0 : i32
    %c0_i32_1 = arith.constant 0 : i32
    return %c0_i32, %c0_i32_0 : i32, i32
  }
  func.func @transform_3(%arg0: i32) -> (i32, i32) {
    %c0_i32 = arith.constant 0 : i32
    %c0_i32_0 = arith.constant 0 : i32
    return %arg0, %c0_i32 : i32, i32
  }
  func.func @transform_4(%arg0: i32) -> (i32, i32) {
    %c0_i32 = arith.constant 0 : i32
    %c0_i32_0 = arith.constant 0 : i32
    return %arg0, %c0_i32 : i32, i32
  }
}

module attributes {stable_mosaic.version = 11 : i64} {
  func.func @kernel(%arg0: memref<16x8xf32, #tpu.memory_space<vmem>>, %arg1: memref<8x8xf32, #tpu.memory_space<vmem>>, %arg2: memref<16x128xf32, #tpu.memory_space<vmem>>, %arg3: memref<16x72xf32, #tpu.memory_space<vmem>>) attributes {dimension_semantics = [], scalar_prefetch = 0 : i64, scratch_operands = 0 : i64, tpu.core_type = #tpu.core_type<tc>} {
    %c0 = arith.constant 0 : index
    %c0_0 = arith.constant 0 : index
    %0 = vector.load %arg0[%c0, %c0_0] : memref<16x8xf32, #tpu.memory_space<vmem>>, vector<16x8xf32>
    %c0_1 = arith.constant 0 : index
    %c0_2 = arith.constant 0 : index
    %1 = vector.load %arg1[%c0_1, %c0_2] : memref<8x8xf32, #tpu.memory_space<vmem>>, vector<8x8xf32>
    %cst = arith.constant dense<0.000000e+00> : vector<8x8xf32>
    %2 = tpu.matmul %1, %1, %cst {dimension_numbers = #tpu.dot_dimension_numbers<[1], [0], [0], [1], [0, 0, 1, 1], [], []>} : vector<8x8xf32>, vector<8x8xf32>, vector<8x8xf32> -> vector<8x8xf32>
    %3 = tpu.concatenate %1, %2 in 1 : vector<8x8xf32>, vector<8x8xf32> -> vector<8x16xf32>
    %4 = vector.extract_strided_slice %3 {offsets = [0, 8], sizes = [8, 8], strides = [1, 1]} : vector<8x16xf32> to vector<8x8xf32>
    %cst_3 = arith.constant dense<0.000000e+00> : vector<8x16xf32>
    %5 = tpu.matmul %4, %3, %cst_3 {dimension_numbers = #tpu.dot_dimension_numbers<[1], [0], [0], [1], [0, 0, 1, 1], [], []>} : vector<8x8xf32>, vector<8x16xf32>, vector<8x16xf32> -> vector<8x16xf32>
    %6 = tpu.concatenate %3, %5 in 1 : vector<8x16xf32>, vector<8x16xf32> -> vector<8x32xf32>
    %7 = vector.extract_strided_slice %6 {offsets = [0, 24], sizes = [8, 8], strides = [1, 1]} : vector<8x32xf32> to vector<8x8xf32>
    %cst_4 = arith.constant dense<0.000000e+00> : vector<8x32xf32>
    %8 = tpu.matmul %7, %6, %cst_4 {dimension_numbers = #tpu.dot_dimension_numbers<[1], [0], [0], [1], [0, 0, 1, 1], [], []>} : vector<8x8xf32>, vector<8x32xf32>, vector<8x32xf32> -> vector<8x32xf32>
    %9 = tpu.concatenate %6, %8 in 1 : vector<8x32xf32>, vector<8x32xf32> -> vector<8x64xf32>
    %cst_5 = arith.constant dense<0.000000e+00> : vector<16x64xf32>
    %10 = tpu.matmul %0, %9, %cst_5 {dimension_numbers = #tpu.dot_dimension_numbers<[1], [0], [0], [1], [0, 0, 1, 1], [], []>} : vector<16x8xf32>, vector<8x64xf32>, vector<16x64xf32> -> vector<16x64xf32>
    %11 = vector.extract_strided_slice %10 {offsets = [0, 0], sizes = [16, 8], strides = [1, 1]} : vector<16x64xf32> to vector<16x8xf32>
    %cst_6 = arith.constant dense<0.000000e+00> : vector<16x16xf32>
    %12 = tpu.matmul %11, %0, %cst_6 {dimension_numbers = #tpu.dot_dimension_numbers<[1], [1], [0], [0], [0, 0, 1, 0], [], []>} : vector<16x8xf32>, vector<16x8xf32>, vector<16x16xf32> -> vector<16x16xf32>
    %c0_7 = arith.constant 0 : index
    %c0_8 = arith.constant 0 : index
    %13 = vector.load %arg2[%c0_7, %c0_8] : memref<16x128xf32, #tpu.memory_space<vmem>>, vector<16x16xf32>
    tpu.vector_store %arg2[%c0_7, %c0_8], %12 {strides = array<i32>} : memref<16x128xf32, #tpu.memory_space<vmem>>, vector<16x16xf32>,
    %14 = vector.extract_strided_slice %10 {offsets = [0, 8], sizes = [16, 8], strides = [1, 1]} : vector<16x64xf32> to vector<16x8xf32>
    %cst_9 = arith.constant dense<0.000000e+00> : vector<16x16xf32>
    %15 = tpu.matmul %14, %0, %cst_9 {dimension_numbers = #tpu.dot_dimension_numbers<[1], [1], [0], [0], [0, 0, 1, 0], [], []>} : vector<16x8xf32>, vector<16x8xf32>, vector<16x16xf32> -> vector<16x16xf32>
    %c0_10 = arith.constant 0 : index
    %c16 = arith.constant 16 : index
    %16 = vector.load %arg2[%c0_10, %c16] : memref<16x128xf32, #tpu.memory_space<vmem>>, vector<16x16xf32>
    tpu.vector_store %arg2[%c0_10, %c16], %15 {strides = array<i32>} : memref<16x128xf32, #tpu.memory_space<vmem>>, vector<16x16xf32>,
    %17 = vector.extract_strided_slice %10 {offsets = [0, 16], sizes = [16, 8], strides = [1, 1]} : vector<16x64xf32> to vector<16x8xf32>
    %cst_11 = arith.constant dense<0.000000e+00> : vector<16x16xf32>
    %18 = tpu.matmul %17, %0, %cst_11 {dimension_numbers = #tpu.dot_dimension_numbers<[1], [1], [0], [0], [0, 0, 1, 0], [], []>} : vector<16x8xf32>, vector<16x8xf32>, vector<16x16xf32> -> vector<16x16xf32>
    %c0_12 = arith.constant 0 : index
    %c32 = arith.constant 32 : index
    %19 = vector.load %arg2[%c0_12, %c32] : memref<16x128xf32, #tpu.memory_space<vmem>>, vector<16x16xf32>
    tpu.vector_store %arg2[%c0_12, %c32], %18 {strides = array<i32>} : memref<16x128xf32, #tpu.memory_space<vmem>>, vector<16x16xf32>,
    %20 = vector.extract_strided_slice %10 {offsets = [0, 24], sizes = [16, 8], strides = [1, 1]} : vector<16x64xf32> to vector<16x8xf32>
    %cst_13 = arith.constant dense<0.000000e+00> : vector<16x16xf32>
    %21 = tpu.matmul %20, %0, %cst_13 {dimension_numbers = #tpu.dot_dimension_numbers<[1], [1], [0], [0], [0, 0, 1, 0], [], []>} : vector<16x8xf32>, vector<16x8xf32>, vector<16x16xf32> -> vector<16x16xf32>
    %c0_14 = arith.constant 0 : index
    %c48 = arith.constant 48 : index
    %22 = vector.load %arg2[%c0_14, %c48] : memref<16x128xf32, #tpu.memory_space<vmem>>, vector<16x16xf32>
    tpu.vector_store %arg2[%c0_14, %c48], %21 {strides = array<i32>} : memref<16x128xf32, #tpu.memory_space<vmem>>, vector<16x16xf32>,
    %23 = vector.extract_strided_slice %10 {offsets = [0, 32], sizes = [16, 8], strides = [1, 1]} : vector<16x64xf32> to vector<16x8xf32>
    %cst_15 = arith.constant dense<0.000000e+00> : vector<16x16xf32>
    %24 = tpu.matmul %23, %0, %cst_15 {dimension_numbers = #tpu.dot_dimension_numbers<[1], [1], [0], [0], [0, 0, 1, 0], [], []>} : vector<16x8xf32>, vector<16x8xf32>, vector<16x16xf32> -> vector<16x16xf32>
    %c0_16 = arith.constant 0 : index
    %c64 = arith.constant 64 : index
    %25 = vector.load %arg2[%c0_16, %c64] : memref<16x128xf32, #tpu.memory_space<vmem>>, vector<16x16xf32>
    tpu.vector_store %arg2[%c0_16, %c64], %24 {strides = array<i32>} : memref<16x128xf32, #tpu.memory_space<vmem>>, vector<16x16xf32>,
    %26 = vector.extract_strided_slice %10 {offsets = [0, 40], sizes = [16, 8], strides = [1, 1]} : vector<16x64xf32> to vector<16x8xf32>
    %cst_17 = arith.constant dense<0.000000e+00> : vector<16x16xf32>
    %27 = tpu.matmul %26, %0, %cst_17 {dimension_numbers = #tpu.dot_dimension_numbers<[1], [1], [0], [0], [0, 0, 1, 0], [], []>} : vector<16x8xf32>, vector<16x8xf32>, vector<16x16xf32> -> vector<16x16xf32>
    %c0_18 = arith.constant 0 : index
    %c80 = arith.constant 80 : index
    %28 = vector.load %arg2[%c0_18, %c80] : memref<16x128xf32, #tpu.memory_space<vmem>>, vector<16x16xf32>
    tpu.vector_store %arg2[%c0_18, %c80], %27 {strides = array<i32>} : memref<16x128xf32, #tpu.memory_space<vmem>>, vector<16x16xf32>,
    %29 = vector.extract_strided_slice %10 {offsets = [0, 48], sizes = [16, 8], strides = [1, 1]} : vector<16x64xf32> to vector<16x8xf32>
    %cst_19 = arith.constant dense<0.000000e+00> : vector<16x16xf32>
    %30 = tpu.matmul %29, %0, %cst_19 {dimension_numbers = #tpu.dot_dimension_numbers<[1], [1], [0], [0], [0, 0, 1, 0], [], []>} : vector<16x8xf32>, vector<16x8xf32>, vector<16x16xf32> -> vector<16x16xf32>
    %c0_20 = arith.constant 0 : index
    %c96 = arith.constant 96 : index
    %31 = vector.load %arg2[%c0_20, %c96] : memref<16x128xf32, #tpu.memory_space<vmem>>, vector<16x16xf32>
    tpu.vector_store %arg2[%c0_20, %c96], %30 {strides = array<i32>} : memref<16x128xf32, #tpu.memory_space<vmem>>, vector<16x16xf32>,
    %32 = vector.extract_strided_slice %10 {offsets = [0, 56], sizes = [16, 8], strides = [1, 1]} : vector<16x64xf32> to vector<16x8xf32>
    %cst_21 = arith.constant dense<0.000000e+00> : vector<16x16xf32>
    %33 = tpu.matmul %32, %0, %cst_21 {dimension_numbers = #tpu.dot_dimension_numbers<[1], [1], [0], [0], [0, 0, 1, 0], [], []>} : vector<16x8xf32>, vector<16x8xf32>, vector<16x16xf32> -> vector<16x16xf32>
    %c0_22 = arith.constant 0 : index
    %c112 = arith.constant 112 : index
    %34 = vector.load %arg2[%c0_22, %c112] : memref<16x128xf32, #tpu.memory_space<vmem>>, vector<16x16xf32>
    tpu.vector_store %arg2[%c0_22, %c112], %33 {strides = array<i32>} : memref<16x128xf32, #tpu.memory_space<vmem>>, vector<16x16xf32>,
    %c0_23 = arith.constant 0 : index
    %c0_24 = arith.constant 0 : index
    %35 = vector.load %arg3[%c0_23, %c0_24] : memref<16x72xf32, #tpu.memory_space<vmem>>, vector<16x8xf32>
    tpu.vector_store %arg3[%c0_23, %c0_24], %0 {strides = array<i32>} : memref<16x72xf32, #tpu.memory_space<vmem>>, vector<16x8xf32>,
    %c0_25 = arith.constant 0 : index
    %c8 = arith.constant 8 : index
    %36 = vector.load %arg3[%c0_25, %c8] : memref<16x72xf32, #tpu.memory_space<vmem>>, vector<16x64xf32>
    tpu.vector_store %arg3[%c0_25, %c8], %10 {strides = array<i32>} : memref<16x72xf32, #tpu.memory_space<vmem>>, vector<16x64xf32>,
    return
  }
}

</mosaic_0001>

<bundles_post_ra>
// kernel: linear_latent_forward.3
= control target key start
LH: loop header
LB: loop body
LE: loop exit
PB: predicated region body
PF: predicated region fallthrough
CT: control target
= control target key end

     0   :  { %vm19_vm0 = vcmask 130048   ;;  %vm66_vm1 = vcmask 588800   ;;  %s124_s1 = inlined_call_operand.vmem [shape: f32[16,128], index: 1, kind: input, shape index: {}]   ;;  %s125_s2 = inlined_call_operand.vmem [shape: f32[16,72], index: 2, kind: input, shape index: {}]   ;;  %s126_s0 = inlined_call_operand.vmem [shape: f32[8,16], index: 0, kind: input, shape index: {}]   ;;  %s127_s3 = inlined_call_operand.vmem [shape: f32[8,128], index: 3, kind: output, shape index: {0}]   ;;  %s128_s4 = inlined_call_operand.vmem [shape: f32[8,72], index: 4, kind: output, shape index: {1}]  }
   0x1   :  { %v18_v0 = vld [vmem:[%s124_s1 + $0x8] sm:$0xff]  ;;  %v17_v2 = vld [vmem:[%s124_s1] sm:$0xff] }
   0x2   :  { %v45_v1 = vld [vmem:[%s125_s2 + $0x8] sm:$0xff]  ;;  %37 = vmatpush.msra.mxu0 %v18_v0  ;;  %v44_v3 = vld [vmem:[%s125_s2] sm:$0xff] }
   0x3   :  { %60 = vmatpush.msra.mxu1 %v45_v1  ;;  %v16_v4 = vld [vmem:[%s126_s0] sm:$0xff] }
   0x4   :  { %38 = vmatpush.msra.mxu0 %v17_v2 }
   0x5   :  { %61 = vmatpush.msra.mxu1 %v44_v3  ;;  %76 = vmatmul.msk.f32.vlgmr.msra.gmra.mxu0 %vm19_vm0, %v16_v4 }
   0x6   :  { %77 = vmatmul.msk.f32.vlgmr.msra.gmra.mxu1 %vm19_vm0, %v16_v4 }
  0x82   :  { %v40_v5 = vpop.f32.mrf.mxu0 }
  0x83   :  { %v63_v6 = vpop.f32.mrf.mxu1  ;;  %43 = vst [vmem:[%s127_s3] sm:$0xff] %v40_v5 }
  0x84   :  { %67 = vst.msk [vmem:[%s128_s4] sm:$0xff] %vm66_vm1, %v63_v6 }

// kernel: linear_latent_forward.2
= control target key start
LH: loop header
LB: loop body
LE: loop exit
PB: predicated region body
PF: predicated region fallthrough
CT: control target
= control target key end

     0   :  { %vm16_vm0 = vcmask 64512   ;;  %s529_s14 = smov 8   ;;  %s530_s15 = smov 120   ;;  %vm74_vm1 = vcmask 130048   ;;  %vm105_vm2 = vcmask 261120   ;;  %vm206_vm3 = vcmask 261248   ;;  %s754_s1 = inlined_call_operand.vmem [shape: f32[8,8], index: 1, kind: input, shape index: {}]   ;;  %s755_s0 = inlined_call_operand.vmem [shape: f32[16,8], index: 0, kind: input, shape index: {}]   ;;  %s756_s2 = inlined_call_operand.vmem [shape: f32[16,128], index: 2, kind: output, shape index: {0}]   ;;  %s757_s3 = inlined_call_operand.vmem [shape: f32[16,72], index: 3, kind: output, shape index: {1}]  }
   0x1   :  { %v15_v0 = vld [vmem:[%s754_s1] sm:$0xff]  ;;  %s531_s16 = smov 16   ;;  %s532_s1 = smov 104   ;;  %v577_v10 = vld [vmem:[%s755_s0 + $0x8] sm:$0xff]  ;;  %vm248_vm4 = vcmask 392448   ;;  %vm290_vm5 = vcmask 523648  }
   0x2   :  { %35 = vmatpush.msra.mxu0 %v15_v0  ;;  %s533_s17 = smov 32   ;;  %v588_v11 = vld [vmem:[%s755_s0] sm:$0xff]  ;;  %s534_s0 = smov 112   ;;  %462 = vst.msk [vmem:[%s757_s3 + $0x8] sm:$0xff] %vm16_vm0, %v577_v10  ;;  %vm332_vm6 = vcmask 654848   ;;  %vm374_vm7 = vcmask 786048  }
   0x3   :  { %480 = vmatmul.msk.f32.vlgmr.msra.gmra.mxu0 %vm16_vm0, %v15_v0  ;;  %s535_s22 = smov 96   ;;  %s536_s23 = smov 72   ;;  %461 = vst.msk [vmem:[%s757_s3] sm:$0xff] %vm16_vm0, %v588_v11  ;;  %vm416_vm8 = vcmask 917248   ;;  %vm458_vm9 = vcmask 1048448   ;;  %vm469_vm10 = vcmask 588864  }
   0x4   :  { %485 = vmatpush.xpose.msk.msrb.mxu0 %vm16_vm0, %v577_v10  ;;  %s537_s24 = smov 80   ;;  %s538_s25 = smov 88  }
   0x5   :  { %s539_s30 = smov 48   ;;  %s540_s4 = smov 64  }
   0x8   :  { %486 = vmatpush.xpose.msk.msrb.mxu0 %vm16_vm0, %v588_v11 }
   0xc   :  { %501 = vmatpush.xpose.msk.msra.mxu0 %vm16_vm0, %v577_v10 }
  0x10   :  { %502 = vmatpush.xpose.msk.msra.mxu0 %vm16_vm0, %v588_v11 }
  0x80   :  { %v37_v1 = vpop.f32.mrf.mxu0 }
  0x81   :  { %41 = vrot.lane.b32.xlu0 %v37_v1, %s529_s14 }
  0xf3   :  { %v42_v2 = vpop.permute.xlu0 %41 }
  0xf4   :  { %v44_v3 = vsel %vm16_vm0, %v15_v0, %v42_v2 }
  0xf5   :  { %46 = vrot.lane.b32.xlu0 %v44_v3, %s530_s15  ;;  %65 = vmatpush.msra.mxu1 %v44_v3 }
  0xf7   :  { %489 = vmatpush.xpose.msk.msrb.mxu1 %vm16_vm0, %v577_v10 }
  0xfb   :  { %490 = vmatpush.xpose.msk.msrb.mxu1 %vm16_vm0, %v588_v11 }
 0x167   :  { %v47_v4 = vpop.permute.xlu0 %46 }
 0x168   :  { %481 = vmatmul.msk.f32.vlgmr.msra.gmra.mxu1 %vm16_vm0, %v47_v4 }
 0x169   :  { %505 = vmatpush.xpose.msk.msra.mxu1 %vm16_vm0, %v577_v10 }
 0x16d   :  { %506 = vmatpush.xpose.msk.msra.mxu1 %vm16_vm0, %v588_v11 }
 0x1e5   :  { %v67_v5 = vpop.f32.mrf.mxu1 }
 0x1e6   :  { %71 = vrot.lane.b32.xlu1 %v67_v5, %s531_s16 }
 0x258   :  { %v72_v6 = vpop.permute.xlu1 %71 }
 0x259   :  { %v75_v7 = vsel %vm74_vm1, %v44_v3, %v72_v6 }
 0x25a   :  { %77 = vrot.lane.b32.xlu1 %v75_v7, %s532_s1  ;;  %96 = vmatpush.msra.mxu2 %v75_v7 }
 0x25c   :  { %493 = vmatpush.xpose.msk.msrb.mxu2 %vm16_vm0, %v577_v10 }
 0x260   :  { %494 = vmatpush.xpose.msk.msrb.mxu2 %vm16_vm0, %v588_v11 }
 0x2cc   :  { %v78_v8 = vpop.permute.xlu1 %77 }
 0x2cd   :  { %482 = vmatmul.msk.f32.vlgmr.msra.gmra.mxu2 %vm16_vm0, %v78_v8 }
 0x2ce   :  { %509 = vmatpush.xpose.msk.msra.mxu2 %vm16_vm0, %v577_v10 }
 0x2d2   :  { %510 = vmatpush.xpose.msk.msra.mxu2 %vm16_vm0, %v588_v11 }
 0x350   :  { %v98_v9 = vpop.f32.mrf.mxu2 }
 0x351   :  { %102 = vrot.lane.b32.xlu2 %v98_v9, %s533_s17 }
 0x3ab   :  { %v103_v12 = vpop.permute.xlu2 %102 }
 0x3ac   :  { %v106_v13 = vsel %vm105_vm2, %v75_v7, %v103_v12 }
 0x3ad   :  { %128 = vmatpush.msra.mxu3 %v106_v13 }
 0x3ae   :  { %483 = vmatmul.msk.f32.vlgmr.msra.gmra.mxu3 %vm16_vm0, %v588_v11 }
 0x3af   :  { %497 = vmatpush.xpose.msk.msrb.mxu3 %vm16_vm0, %v577_v10 }
 0x3b3   :  { %498 = vmatpush.xpose.msk.msrb.mxu3 %vm16_vm0, %v588_v11 }
 0x3b6   :  { %484 = vmatmul.msk.f32.gmra.mxu3 %vm16_vm0, %v577_v10 }
 0x3b7   :  { %513 = vmatpush.xpose.msk.msra.mxu3 %vm16_vm0, %v577_v10 }
 0x3bb   :  { %514 = vmatpush.xpose.msk.msra.mxu3 %vm16_vm0, %v588_v11 }
 0x431   :  { %v620_v14 = vpop.f32.mrf.mxu3 }
 0x432   :  { %167 = vrot.lane.b32.xlu1 %v620_v14, %s530_s15  ;;  %251 = vrot.lane.b32.xlu0 %v620_v14, %s532_s1 }
 0x433   :  { %209 = vrot.lane.b32.xlu2 %v620_v14, %s534_s0  ;;  %487 = vmatmul.msk.f32.vlgmr.msrb.gmra.mxu0 %vm16_vm0, %v620_v14 }
 0x439   :  { %v630_v15 = vpop.f32.mrf.mxu3 }
 0x43a   :  { %169 = vrot.lane.b32.xlu1 %v630_v15, %s530_s15  ;;  %253 = vrot.lane.b32.xlu0 %v630_v15, %s532_s1 }
 0x43b   :  { %211 = vrot.lane.b32.xlu2 %v630_v15, %s534_s0  ;;  %488 = vmatmul.msk.f32.gmra.mxu0 %vm16_vm0, %v630_v15 }
 0x442   :  { %293 = vrot.lane.b32.xlu1 %v620_v14, %s535_s22  ;;  %419 = vrot.lane.b32.xlu0 %v620_v14, %s536_s23 }
 0x443   :  { %377 = vrot.lane.b32.xlu2 %v620_v14, %s537_s24 }
 0x44a   :  { %421 = vrot.lane.b32.xlu1 %v630_v15, %s536_s23  ;;  %379 = vrot.lane.b32.xlu0 %v630_v15, %s537_s24 }
 0x44b   :  { %335 = vrot.lane.b32.xlu2 %v620_v14, %s538_s25 }
 0x452   :  { %337 = vrot.lane.b32.xlu0 %v630_v15, %s538_s25 }
 0x453   :  { %295 = vrot.lane.b32.xlu2 %v630_v15, %s535_s22 }
 0x48d   :  { %v210_v16 = vpop.permute.xlu2 %209 }
 0x48e   :  { %495 = vmatmul.msk.f32.vlgmr.msrb.gmra.mxu2 %vm16_vm0, %v210_v16 }
 0x495   :  { %v212_v17 = vpop.permute.xlu2 %211 }
 0x496   :  { %496 = vmatmul.msk.f32.gmra.mxu2 %vm16_vm0, %v212_v17 }
 0x49d   :  { %v378_v18 = vpop.permute.xlu2 %377 }
 0x49e   :  { %511 = vmatmul.msk.f32.vlgmr.msra.gmra.mxu2 %vm16_vm0, %v378_v18 }
 0x4a4   :  { %v168_v19 = vpop.permute.xlu1 %167  ;;  %v252_v20 = vpop.permute.xlu0 %251 }
 0x4a5   :  { %491 = vmatmul.msk.f32.vlgmr.msrb.gmra.mxu1 %vm16_vm0, %v168_v19  ;;  %499 = vmatmul.msk.f32.vlgmr.msrb.gmra.mxu3 %vm16_vm0, %v252_v20  ;;  %v336_v24 = vpop.permute.xlu2 %335 }
 0x4ac   :  { %v170_v21 = vpop.permute.xlu1 %169  ;;  %v254_v22 = vpop.permute.xlu0 %253 }
 0x4ad   :  { %492 = vmatmul.msk.f32.gmra.mxu1 %vm16_vm0, %v170_v21  ;;  %500 = vmatmul.msk.f32.gmra.mxu3 %vm16_vm0, %v254_v22  ;;  %v296_v28 = vpop.permute.xlu2 %295 }
 0x4b0   :  { %v159_v23 = vpop.f32.mrf.mxu0 }
 0x4b1   :  { %165 = vst.msk [vmem:[%s756_s2] sm:$0xff] %vm74_vm1, %v159_v23 }
 0x4b4   :  { %v294_v25 = vpop.permute.xlu1 %293  ;;  %v420_v26 = vpop.permute.xlu0 %419 }
 0x4b5   :  { %503 = vmatmul.msk.f32.vlgmr.msra.gmra.mxu0 %vm16_vm0, %v294_v25  ;;  %507 = vmatmul.msk.f32.vlgmr.msra.gmra.mxu1 %vm16_vm0, %v336_v24 }
 0x4b6   :  { %515 = vmatmul.msk.f32.vlgmr.msra.gmra.mxu3 %vm16_vm0, %v420_v26 }
 0x4b8   :  { %v162_v27 = vpop.f32.mrf.mxu0 }
 0x4b9   :  { %166 = vst.msk [vmem:[%s756_s2 + $0x8] sm:$0xff] %vm74_vm1, %v162_v27 }
 0x4bc   :  { %v422_v29 = vpop.permute.xlu1 %421  ;;  %v380_v30 = vpop.permute.xlu0 %379 }
 0x4bd   :  { %504 = vmatmul.msk.f32.gmra.mxu0 %vm16_vm0, %v296_v28  ;;  %512 = vmatmul.msk.f32.gmra.mxu2 %vm16_vm0, %v380_v30 }
 0x4be   :  { %516 = vmatmul.msk.f32.gmra.mxu3 %vm16_vm0, %v422_v29 }
 0x4c4   :  { %v338_v31 = vpop.permute.xlu0 %337 }
 0x4c5   :  { %508 = vmatmul.msk.f32.gmra.mxu1 %vm16_vm0, %v338_v31 }
 0x511   :  { %v234_v32 = vpop.f32.mrf.mxu2 }
 0x512   :  { %242 = vrot.lane.b32.xlu0 %v234_v32, %s533_s17 }
 0x519   :  { %v237_v35 = vpop.f32.mrf.mxu2 }
 0x521   :  { %v402_v39 = vpop.f32.mrf.mxu2 }
 0x522   :  { %v192_v33 = vpop.f32.mrf.mxu1 }
 0x523   :  { %200 = vrot.lane.b32.xlu1 %v192_v33, %s531_s16 }
 0x528   :  { %v276_v34 = vpop.f32.mrf.mxu3 }
 0x529   :  { %284 = vrot.lane.b32.xlu2 %v276_v34, %s539_s30 }
 0x52a   :  { %v195_v36 = vpop.f32.mrf.mxu1 }
 0x530   :  { %v279_v37 = vpop.f32.mrf.mxu3 }
 0x531   :  { %202 = vrot.lane.b32.xlu2 %v195_v36, %s531_s16  ;;  %286 = vrot.lane.b32.xlu0 %v279_v37, %s539_s30 }
 0x532   :  { %v318_v38 = vpop.f32.mrf.mxu0  ;;  %v360_v40 = vpop.f32.mrf.mxu1 }
 0x533   :  { %326 = vrot.lane.b32.xlu1 %v318_v38, %s540_s4 }
 0x539   :  { %368 = vrot.lane.b32.xlu0 %v360_v40, %s537_s24  ;;  %v444_v42 = vpop.f32.mrf.mxu3 }
 0x53a   :  { %v321_v41 = vpop.f32.mrf.mxu0 }
 0x53b   :  { %244 = vrot.lane.b32.xlu1 %v237_v35, %s533_s17  ;;  %328 = vrot.lane.b32.xlu2 %v321_v41, %s540_s4 }
 0x540   :  { %v405_v43 = vpop.f32.mrf.mxu2 }
 0x541   :  { %412 = vrot.lane.b32.xlu0 %v405_v43, %s535_s22  ;;  %v447_v44 = vpop.f32.mrf.mxu3 }
 0x542   :  { %v363_v45 = vpop.f32.mrf.mxu1 }
 0x543   :  { %452 = vrot.lane.b32.xlu1 %v444_v42, %s534_s0  ;;  %410 = vrot.lane.b32.xlu2 %v402_v39, %s535_s22 }
 0x549   :  { %463 = vrot.lane.b32.xlu0 %v620_v14, %s529_s14 }
 0x54b   :  { %370 = vrot.lane.b32.xlu1 %v363_v45, %s537_s24  ;;  %454 = vrot.lane.b32.xlu2 %v447_v44, %s534_s0 }
 0x553   :  { %465 = vrot.lane.b32.xlu1 %v630_v15, %s529_s14 }
 0x583   :  { %v285_v46 = vpop.permute.xlu2 %284 }
 0x584   :  { %v243_v49 = vpop.permute.xlu0 %242 }
 0x58b   :  { %v203_v47 = vpop.permute.xlu2 %202 }
 0x58c   :  { %208 = vst.msk [vmem:[%s756_s2 + $0x8] sm:$0xff] %vm206_vm3, %v203_v47 }
 0x595   :  { %v201_v48 = vpop.permute.xlu1 %200  ;;  %v329_v50 = vpop.permute.xlu2 %328 }
 0x596   :  { %207 = vst.msk [vmem:[%s756_s2] sm:$0xff] %vm206_vm3, %v201_v48 }
 0x597   :  { %249 = vst.msk [vmem:[%s756_s2] sm:$0xff] %vm248_vm4, %v243_v49 }
 0x598   :  { %291 = vst.msk [vmem:[%s756_s2] sm:$0xff] %vm290_vm5, %v285_v46 }
 0x59d   :  { %v411_v54 = vpop.permute.xlu2 %410 }
 0x5a3   :  { %v287_v51 = vpop.permute.xlu0 %286 }
 0x5a5   :  { %v327_v52 = vpop.permute.xlu1 %326  ;;  %v455_v60 = vpop.permute.xlu2 %454 }
 0x5a6   :  { %333 = vst.msk [vmem:[%s756_s2] sm:$0xff] %vm332_vm6, %v327_v52 }
 0x5ab   :  { %v369_v53 = vpop.permute.xlu0 %368 }
 0x5ac   :  { %375 = vst.msk [vmem:[%s756_s2] sm:$0xff] %vm374_vm7, %v369_v53 }
 0x5ad   :  { %v245_v55 = vpop.permute.xlu1 %244  ;;  %417 = vst.msk [vmem:[%s756_s2] sm:$0xff] %vm416_vm8, %v411_v54 }
 0x5ae   :  { %250 = vst.msk [vmem:[%s756_s2 + $0x8] sm:$0xff] %vm248_vm4, %v245_v55 }
 0x5af   :  { %292 = vst.msk [vmem:[%s756_s2 + $0x8] sm:$0xff] %vm290_vm5, %v287_v51 }
 0x5b0   :  { %334 = vst.msk [vmem:[%s756_s2 + $0x8] sm:$0xff] %vm332_vm6, %v329_v50 }
 0x5b3   :  { %v413_v56 = vpop.permute.xlu0 %412 }
 0x5b5   :  { %v453_v57 = vpop.permute.xlu1 %452 }
 0x5b6   :  { %459 = vst.msk [vmem:[%s756_s2] sm:$0xff] %vm458_vm9, %v453_v57 }
 0x5bb   :  { %v464_v58 = vpop.permute.xlu0 %463 }
 0x5bc   :  { %470 = vst.msk [vmem:[%s757_s3] sm:$0xff] %vm469_vm10, %v464_v58 }
 0x5bd   :  { %v371_v59 = vpop.permute.xlu1 %370 }
 0x5be   :  { %376 = vst.msk [vmem:[%s756_s2 + $0x8] sm:$0xff] %vm374_vm7, %v371_v59 }
 0x5bf   :  { %418 = vst.msk [vmem:[%s756_s2 + $0x8] sm:$0xff] %vm416_vm8, %v413_v56 }
 0x5c0   :  { %460 = vst.msk [vmem:[%s756_s2 + $0x8] sm:$0xff] %vm458_vm9, %v455_v60 }
 0x5c5   :  { %v466_v61 = vpop.permute.xlu1 %465 }
 0x5c6   :  { %471 = vst.msk [vmem:[%s757_s3 + $0x8] sm:$0xff] %vm469_vm10, %v466_v61 }

</bundles_post_ra>
